<compile_context>
chip_gen: v5e
topology: v5e:2x2
jax: 0.10.0
libtpu: 0.0.40
codegen_flags: <defaults>
</compile_context>

<pallas_src>
import jax
import jax.numpy as jnp
from jax.experimental import pallas as pl
from jax.experimental.pallas import tpu as pltpu

# ---- model dimensions (synthetic, consistent with the module) ----
B, C, H, W = 2, 4, 16, 16          # small NCHW image batch
IN_FEAT = C * H * W                # 1024, flattened image features
OUT_SIZE = 64                      # img_enc.out_size
OUT_PAD = 128                      # lane-padded encoder width
HID = 128                          # lin_head hidden width
HEAD_SIZES = (11, 6, 15, 2, 2, 3, 3)   # colour, material, name, hor, ver, pos, bb
TOTAL_HEADS = sum(HEAD_SIZES)      # 42
HEADS_PAD = 128                    # lane-padded fused head width

TILE_B_CAP = 512                   # sweep 256/512/1024; 512 ~= roofline knee


def _round_up(x, m):
    return ((x + m - 1) // m) * m


def attribute_kernel(x_ref, we_ref, be_ref, w1_ref, b1_ref, wh_ref, bh_ref,
                     out_ref):
    """Fused forward: enc -> relu -> lin -> relu -> fused heads (3 MXU matmuls)."""
    x = x_ref[...].astype(jnp.bfloat16)                         # [TB, IN_FEAT]
    # img_enc: Linear(IN_FEAT, OUT_SIZE), zero-padded to OUT_PAD lanes.
    enc = jnp.dot(x, we_ref[...],
                  preferred_element_type=jnp.float32) + be_ref[...]
    # lin_head: ReLU -> Linear(OUT_SIZE, 128) -> ReLU
    h = jnp.maximum(enc, 0.0).astype(jnp.bfloat16)
    h = jnp.dot(h, w1_ref[...],
                preferred_element_type=jnp.float32) + b1_ref[...]
    h = jnp.maximum(h, 0.0).astype(jnp.bfloat16)
    # 7 heads fused as one Linear(128, 42), zero-padded to 128 lanes.
    out_ref[...] = (jnp.dot(h, wh_ref[...],
                            preferred_element_type=jnp.float32) + bh_ref[...])


def attribute_forward(img, params):
    """img: [B, C, H, W] float32 (NCHW). Returns the 7-tuple of head outputs."""
    b = img.shape[0]
    # torch.flatten(x, 1): row-major over (C, H, W); a free reshape, no copy.
    x_flat = img.reshape(b, -1)

    # Batch tile: capped at TILE_B_CAP, sized so batches that can fill two
    # tiles produce >= 2 grid steps (uses both TensorCores on v7x), rounded to
    # the 8-row sublane granularity.  NO wrapper-side padding of the
    # activations: Pallas masks the partial edge block.
    tile_b = max(8, min(TILE_B_CAP, _round_up(pl.cdiv(b, 2), 8)))
    num_blocks = pl.cdiv(b, tile_b)
    b_pad = num_blocks * tile_b        # output stays tile-padded (kernel-written)

    we, be, w1, b1, wh, bh = (params["we"], params["be"], params["w1"],
                              params["b1"], params["wh"], params["bh"])

    # Weights/biases: constant block index -> DMA'd once, VMEM-resident across
    # all batch-grid steps.
    const2d = lambda shape: pl.BlockSpec(shape, lambda i: (0, 0))

    out = pl.pallas_call(
        attribute_kernel,
        out_shape=jax.ShapeDtypeStruct((b_pad, HEADS_PAD), jnp.float32),
        grid=(num_blocks,),
        in_specs=[
            pl.BlockSpec((tile_b, IN_FEAT), lambda i: (i, 0)),  # activations tiled
            const2d((IN_FEAT, OUT_PAD)),
            const2d((1, OUT_PAD)),
            const2d((OUT_PAD, HID)),
            const2d((1, HID)),
            const2d((HID, HEADS_PAD)),
            const2d((1, HEADS_PAD)),
        ],
        out_specs=pl.BlockSpec((tile_b, HEADS_PAD), lambda i: (i, 0)),
        compiler_params=pltpu.CompilerParams(
            dimension_semantics=("parallel",),
            vmem_limit_bytes=32 * 1024 * 1024),
    )(x_flat, we, be, w1, b1, wh, bh)

    # Drop batch / lane padding and split into the 7 attribute heads.
    out = out[:b, :TOTAL_HEADS]
    splits, off = [], 0
    for sz in HEAD_SIZES:
        splits.append(out[:, off:off + sz])
        off += sz
    col, mat, name, hor, ver, pos, bb = splits
    return col, mat, name, hor, ver, pos, bb


def init_params(key):
    """PyTorch-Linear-style init U(-1/sqrt(fan_in), 1/sqrt(fan_in)).

    Weights are stored bf16 (halves HBM weight traffic) and zero-padded to
    lane-aligned widths; biases stay f32 and are zero-padded to match.  The
    padded regions MUST be exactly zero for the head slice to be correct.
    """
    ks = jax.random.split(key, 6)

    def lin(kw, kb, fan_in, fan_out, pad_in, pad_out):
        bound = 1.0 / jnp.sqrt(jnp.float32(fan_in))
        w = jax.random.uniform(kw, (fan_in, fan_out), jnp.float32, -bound, bound)
        b_ = jax.random.uniform(kb, (1, fan_out), jnp.float32, -bound, bound)
        w = jnp.pad(w, ((0, pad_in - fan_in), (0, pad_out - fan_out)))
        b_ = jnp.pad(b_, ((0, 0), (0, pad_out - fan_out)))
        return w.astype(jnp.bfloat16), b_

    we, be = lin(ks[0], ks[1], IN_FEAT, OUT_SIZE, IN_FEAT, OUT_PAD)  # img_enc
    w1, b1 = lin(ks[2], ks[3], OUT_SIZE, HID, OUT_PAD, HID)          # lin_head
    wh, bh = lin(ks[4], ks[5], HID, TOTAL_HEADS, HID, HEADS_PAD)     # fused heads
    return {"we": we, "be": be, "w1": w1, "b1": b1, "wh": wh, "bh": bh}


def check_padding_invariant(params):
    """Externally supplied checkpoints must keep padded regions exactly zero."""
    assert float(jnp.abs(params["we"][:, OUT_SIZE:]).max()) == 0.0
    assert float(jnp.abs(params["be"][:, OUT_SIZE:]).max()) == 0.0
    assert float(jnp.abs(params["w1"][OUT_SIZE:, :]).max()) == 0.0
    assert float(jnp.abs(params["wh"][:, TOTAL_HEADS:]).max()) == 0.0
    assert float(jnp.abs(params["bh"][:, TOTAL_HEADS:]).max()) == 0.0


def reference_forward(img, params):
    """Plain-JAX reference mirroring the kernel's bf16-input / f32-acc matmuls."""
    x = img.reshape(img.shape[0], -1).astype(jnp.bfloat16)
    we = params["we"][:, :OUT_SIZE]
    be = params["be"][:, :OUT_SIZE]
    w1 = params["w1"][:OUT_SIZE, :HID]
    b1 = params["b1"]
    wh = params["wh"][:, :TOTAL_HEADS]
    bh = params["bh"][:, :TOTAL_HEADS]

    enc = jnp.dot(x, we, preferred_element_type=jnp.float32) + be
    h = jnp.maximum(enc, 0.0).astype(jnp.bfloat16)
    h = jnp.dot(h, w1, preferred_element_type=jnp.float32) + b1
    h = jnp.maximum(h, 0.0).astype(jnp.bfloat16)
    out = jnp.dot(h, wh, preferred_element_type=jnp.float32) + bh

    splits, off = [], 0
    for sz in HEAD_SIZES:
        splits.append(out[:, off:off + sz])
        off += sz
    return tuple(splits)


def _check(img, params):
    outs = jax.block_until_ready(attribute_forward(img, params))
    refs = reference_forward(img, params)
    b = img.shape[0]
    for o, r, sz in zip(outs, refs, HEAD_SIZES):
        assert o.shape == (b, sz), (o.shape, (b, sz))
        assert jnp.allclose(o, r, atol=1e-3, rtol=1e-3), (
            float(jnp.max(jnp.abs(o - r))))


if __name__ == "__main__":
    key = jax.random.PRNGKey(0)
    k_img, k_par, k_big = jax.random.split(key, 3)
    params = init_params(k_par)
    check_padding_invariant(params)

    # Shipped tiny-batch case (B=2): single partial edge block.
    img = jax.random.normal(k_img, (B, C, H, W), jnp.float32)
    _check(img, params)

    # Larger batch, not a multiple of the tile: exercises the 2-step grid
    # (both v7x TensorCores) and the masked partial edge block.
    img_big = jax.random.normal(k_big, (200, C, H, W), jnp.float32)
    _check(img_big, params)

    print("KERNEL_OK")
</pallas_src>

<mosaic_0001>
module attributes {stable_mosaic.version = 11 : i64} {
  func.func @attribute_kernel(%arg0: i32, %arg1: memref<8x1024xf32, #tpu.memory_space<vmem>>, %arg2: memref<1024x128xbf16, #tpu.memory_space<vmem>>, %arg3: memref<1x128xf32, #tpu.memory_space<vmem>>, %arg4: memref<128x128xbf16, #tpu.memory_space<vmem>>, %arg5: memref<1x128xf32, #tpu.memory_space<vmem>>, %arg6: memref<128x128xbf16, #tpu.memory_space<vmem>>, %arg7: memref<1x128xf32, #tpu.memory_space<vmem>>, %arg8: memref<8x128xf32, #tpu.memory_space<vmem>>) attributes {dimension_semantics = [#tpu.dimension_semantics<parallel>], iteration_bounds = array<i64: 1>, scalar_prefetch = 0 : i64, scratch_operands = 0 : i64, tpu.core_type = #tpu.core_type<tc>, window_params = [{transform_indices = @transform_0, window_bounds = array<i64: 8, 1024>}, {pipeline_mode = #tpu.pipeline_mode<synchronous>, transform_indices = @transform_1, window_bounds = array<i64: 1024, 128>}, {pipeline_mode = #tpu.pipeline_mode<synchronous>, transform_indices = @transform_2, window_bounds = array<i64: 1, 128>}, {pipeline_mode = #tpu.pipeline_mode<synchronous>, transform_indices = @transform_3, window_bounds = array<i64: 128, 128>}, {pipeline_mode = #tpu.pipeline_mode<synchronous>, transform_indices = @transform_4, window_bounds = array<i64: 1, 128>}, {pipeline_mode = #tpu.pipeline_mode<synchronous>, transform_indices = @transform_5, window_bounds = array<i64: 128, 128>}, {pipeline_mode = #tpu.pipeline_mode<synchronous>, transform_indices = @transform_6, window_bounds = array<i64: 1, 128>}, {transform_indices = @transform_7, window_bounds = array<i64: 8, 128>}]} {
    %c0 = arith.constant 0 : index
    %c0_0 = arith.constant 0 : index
    %0 = vector.load %arg1[%c0, %c0_0] : memref<8x1024xf32, #tpu.memory_space<vmem>>, vector<8x1024xf32>
    %1 = arith.truncf %0 : vector<8x1024xf32> to vector<8x1024xbf16>
    %c0_1 = arith.constant 0 : index
    %c0_2 = arith.constant 0 : index
    %2 = vector.load %arg2[%c0_1, %c0_2] : memref<1024x128xbf16, #tpu.memory_space<vmem>>, vector<1024x128xbf16>
    %cst = arith.constant dense<0.000000e+00> : vector<8x128xf32>
    %3 = tpu.matmul %1, %2, %cst {dimension_numbers = #tpu.dot_dimension_numbers<[1], [0], [0], [1], [0, 0, 1, 1], [], []>} : vector<8x1024xbf16>, vector<1024x128xbf16>, vector<8x128xf32> -> vector<8x128xf32>
    %c0_3 = arith.constant 0 : index
    %c0_4 = arith.constant 0 : index
    %4 = vector.load %arg3[%c0_3, %c0_4] : memref<1x128xf32, #tpu.memory_space<vmem>>, vector<1x128xf32>
    %5 = vector.broadcast %4 : vector<1x128xf32> to vector<8x128xf32>
    %6 = arith.addf %3, %5 : vector<8x128xf32>
    %cst_5 = arith.constant 0.000000e+00 : f32
    %7 = vector.broadcast %cst_5 : f32 to vector<8x128xf32>
    %8 = arith.maximumf %6, %7 : vector<8x128xf32>
    %9 = arith.truncf %8 : vector<8x128xf32> to vector<8x128xbf16>
    %c0_6 = arith.constant 0 : index
    %c0_7 = arith.constant 0 : index
    %10 = vector.load %arg4[%c0_6, %c0_7] : memref<128x128xbf16, #tpu.memory_space<vmem>>, vector<128x128xbf16>
    %cst_8 = arith.constant dense<0.000000e+00> : vector<8x128xf32>
    %11 = tpu.matmul %9, %10, %cst_8 {dimension_numbers = #tpu.dot_dimension_numbers<[1], [0], [0], [1], [0, 0, 1, 1], [], []>} : vector<8x128xbf16>, vector<128x128xbf16>, vector<8x128xf32> -> vector<8x128xf32>
    %c0_9 = arith.constant 0 : index
    %c0_10 = arith.constant 0 : index
    %12 = vector.load %arg5[%c0_9, %c0_10] : memref<1x128xf32, #tpu.memory_space<vmem>>, vector<1x128xf32>
    %13 = vector.broadcast %12 : vector<1x128xf32> to vector<8x128xf32>
    %14 = arith.addf %11, %13 : vector<8x128xf32>
    %cst_11 = arith.constant 0.000000e+00 : f32
    %15 = vector.broadcast %cst_11 : f32 to vector<8x128xf32>
    %16 = arith.maximumf %14, %15 : vector<8x128xf32>
    %17 = arith.truncf %16 : vector<8x128xf32> to vector<8x128xbf16>
    %c0_12 = arith.constant 0 : index
    %c0_13 = arith.constant 0 : index
    %18 = vector.load %arg6[%c0_12, %c0_13] : memref<128x128xbf16, #tpu.memory_space<vmem>>, vector<128x128xbf16>
    %cst_14 = arith.constant dense<0.000000e+00> : vector<8x128xf32>
    %19 = tpu.matmul %17, %18, %cst_14 {dimension_numbers = #tpu.dot_dimension_numbers<[1], [0], [0], [1], [0, 0, 1, 1], [], []>} : vector<8x128xbf16>, vector<128x128xbf16>, vector<8x128xf32> -> vector<8x128xf32>
    %c0_15 = arith.constant 0 : index
    %c0_16 = arith.constant 0 : index
    %20 = vector.load %arg7[%c0_15, %c0_16] : memref<1x128xf32, #tpu.memory_space<vmem>>, vector<1x128xf32>
    %21 = vector.broadcast %20 : vector<1x128xf32> to vector<8x128xf32>
    %22 = arith.addf %19, %21 : vector<8x128xf32>
    %c0_17 = arith.constant 0 : index
    %c0_18 = arith.constant 0 : index
    %23 = vector.load %arg8[%c0_17, %c0_18] : memref<8x128xf32, #tpu.memory_space<vmem>>, vector<8x128xf32>
    tpu.vector_store %arg8[%c0_17, %c0_18], %22 {strides = array<i32>} : memref<8x128xf32, #tpu.memory_space<vmem>>, vector<8x128xf32>,
    return
  }
  func.func @transform_0(%arg0: i32) -> (i32, i32) {
    %c0_i32 = arith.constant 0 : i32
    %c0_i32_0 = arith.constant 0 : i32
    return %arg0, %c0_i32 : i32, i32
  }
  func.func @transform_1(%arg0: i32) -> (i32, i32) {
    %c0_i32 = arith.constant 0 : i32
    %c0_i32_0 = arith.constant 0 : i32
    %c0_i32_1 = arith.constant 0 : i32
    return %c0_i32, %c0_i32_0 : i32, i32
  }
  func.func @transform_2(%arg0: i32) -> (i32, i32) {
    %c0_i32 = arith.constant 0 : i32
    %c0_i32_0 = arith.constant 0 : i32
    %c0_i32_1 = arith.constant 0 : i32
    return %c0_i32, %c0_i32_0 : i32, i32
  }
  func.func @transform_3(%arg0: i32) -> (i32, i32) {
    %c0_i32 = arith.constant 0 : i32
    %c0_i32_0 = arith.constant 0 : i32
    %c0_i32_1 = arith.constant 0 : i32
    return %c0_i32, %c0_i32_0 : i32, i32
  }
  func.func @transform_4(%arg0: i32) -> (i32, i32) {
    %c0_i32 = arith.constant 0 : i32
    %c0_i32_0 = arith.constant 0 : i32
    %c0_i32_1 = arith.constant 0 : i32
    return %c0_i32, %c0_i32_0 : i32, i32
  }
  func.func @transform_5(%arg0: i32) -> (i32, i32) {
    %c0_i32 = arith.constant 0 : i32
    %c0_i32_0 = arith.constant 0 : i32
    %c0_i32_1 = arith.constant 0 : i32
    return %c0_i32, %c0_i32_0 : i32, i32
  }
  func.func @transform_6(%arg0: i32) -> (i32, i32) {
    %c0_i32 = arith.constant 0 : i32
    %c0_i32_0 = arith.constant 0 : i32
    %c0_i32_1 = arith.constant 0 : i32
    return %c0_i32, %c0_i32_0 : i32, i32
  }
  func.func @transform_7(%arg0: i32) -> (i32, i32) {
    %c0_i32 = arith.constant 0 : i32
    %c0_i32_0 = arith.constant 0 : i32
    return %arg0, %c0_i32 : i32, i32
  }
}

</mosaic_0001>

<bundles_post_ra>
// kernel: tpu_custom_call.1
= control target key start
LH: loop header
LB: loop body
LE: loop exit
PB: predicated region body
PF: predicated region fallthrough
CT: control target
= control target key end

     0   :  { %12 = vsyncpa [#allocation3], 0  ;;  %s1564_s0 = inlined_call_operand.hbm [shape: f32[2,1024], index: 0, kind: input, shape index: {}]   ;;  %s1565_s1 = inlined_call_operand.hbm [shape: bf16[1024,128], index: 1, kind: input, shape index: {}]   ;;  %s1566_s2 = inlined_call_operand.vmem [shape: f32[1,128], index: 2, kind: input, shape index: {}]   ;;  %s1567_s3 = inlined_call_operand.hbm [shape: bf16[128,128], index: 3, kind: input, shape index: {}]   ;;  %s1568_s4 = inlined_call_operand.vmem [shape: f32[1,128], index: 4, kind: input, shape index: {}]   ;;  %s1569_s5 = inlined_call_operand.hbm [shape: bf16[128,128], index: 5, kind: input, shape index: {}]   ;;  %s1570_s6 = inlined_call_operand.vmem [shape: f32[1,128], index: 6, kind: input, shape index: {}]   ;;  %s1571_s7 = inlined_call_operand.hbm [shape: f32[8,128], index: 7, kind: output, shape index: {}]  }
   0x1   :  { %13 = vsyncpa [#allocation6], 0 }
   0x2   :  { %14 = vsyncpa [#allocation9], 0 }
   0x3   :  { %15 = vsyncpa [#allocation4], 0  ;;  %s33_s26 = sshll.u32 %s1565_s1, 4  ;;  %s34_s26 = int_to_ptr.hbm [resolvable:$true] %s33_s26 }
   0x4   :  { %19 = vsyncadd [#allocation3], 768  ;;  %s1491_s27 = smov [#allocation5]   ;;  %s20_s8 = sshll.u32 %s1564_s0, 4  ;;  %s21_s8 = int_to_ptr.hbm [resolvable:$true] %s20_s8 }
   0x5   :  { %s35_s28 = sshll.u32 %s1491_s27, 4  ;;  %s1492_s9 = smov 64   ;;  %s36_s28 = int_to_ptr.vmem [resolvable:$true] %s35_s28 }
   0x6   :  { %s1493_s10 = smov 4   ;;  %s1494_s11 = smov [#allocation2]  }
   0x7   :  { %41 = dma.hbm_to_vmem [thread:$0]  %s34_s26, 8192, %s36_s28, [#allocation6], %s1492_s9, %s1492_s9, %s1493_s10  }
   0x8   :  { %s22_s12 = sshll.u32 %s1494_s11, 4  ;;  %s1495_s13 = smov 256   ;;  %s23_s12 = int_to_ptr.vmem [resolvable:$true] %s22_s12 }
   0x9   :  { %s1496_s14 = smov 16   ;;  %s48_s16 = sshll.u32 %s1567_s3, 4  ;;  %s49_s16 = int_to_ptr.hbm [resolvable:$true] %s48_s16 }
   0xa   :  { %28 = dma.hbm_to_vmem [thread:$0]  %s21_s8, 256, %s23_s12, [#allocation3], %s1495_s13, %s1495_s13, %s1496_s14  }
   0xb   :  { %s1497_s17 = smov [#allocation7]   ;;  %s63_s20 = sshll.u32 %s1569_s5, 4  ;;  %s64_s20 = int_to_ptr.hbm [resolvable:$true] %s63_s20 }
   0xc   :  { %s50_s18 = sshll.u32 %s1497_s17, 4  ;;  %s1498_s21 = smov [#allocation8]   ;;  %s51_s18 = int_to_ptr.vmem [resolvable:$true] %s50_s18 }
   0xd   :  { %56 = dma.hbm_to_vmem [thread:$0]  %s49_s16, 1024, %s51_s18, [#allocation6], %s1492_s9, %s1492_s9, %s1493_s10  }
   0xe   :  { %s65_s22 = sshll.u32 %s1498_s21, 4  ;;  %s66_s22 = int_to_ptr.vmem [resolvable:$true] %s65_s22 }
   0xf   :  { %71 = dma.hbm_to_vmem [thread:$0]  %s64_s20, 1024, %s66_s22, [#allocation9], %s1492_s9, %s1492_s9, %s1493_s10  }
  0x10   :  { %1483 = dma.done.wait [#allocation3], 1024  }
  0x11   :  { %1484 = vsyncadd [#allocation3], 4294966272 }
  0x12   :  { %1485 = dma.done.wait [#allocation6], 9216  }
  0x13   :  { %1486 = vsyncadd [#allocation6], 4294958080 }
  0x14   :  { %1487 = dma.done.wait [#allocation9], 1024  }
  0x15   :  { %1488 = vsyncadd [#allocation9], 4294966272  ;;  %v1278_v0 = vld [vmem:[#allocation5 + $0x38] sm:$0xff]  ;;  %v1277_v4 = vld [vmem:[#allocation5 + $0x30] sm:$0xff]  ;;  %s1499_s26 = smov [#allocation10]   ;;  %s939_s30 = sshll.u32 %s1571_s7, 4  ;;  %s940_s30 = int_to_ptr.hbm [resolvable:$true] %s939_s30 }
  0x16   :  { %v1286_v1 = vld [vmem:[#allocation5 + $0x78] sm:$0xff]  ;;  %661 = vmatpush.bf16.msra.mxu0 %v1278_v0  ;;  %v1285_v5 = vld [vmem:[#allocation5 + $0x70] sm:$0xff]  ;;  %v1276_v8 = vld [vmem:[#allocation5 + $0x28] sm:$0xff]  ;;  %s937_s27 = sshll.u32 %s1499_s26, 4  ;;  %s938_s27 = int_to_ptr.vmem [resolvable:$true] %s937_s27 }
  0x17   :  { %v1294_v2 = vld [vmem:[#allocation5 + $0xb8] sm:$0xff]  ;;  %674 = vmatpush.bf16.msra.mxu1 %v1286_v1  ;;  %v1293_v6 = vld [vmem:[#allocation5 + $0xb0] sm:$0xff]  ;;  %v1284_v9 = vld [vmem:[#allocation5 + $0x68] sm:$0xff] }
  0x18   :  { %v1302_v3 = vld [vmem:[#allocation5 + $0xf8] sm:$0xff]  ;;  %687 = vmatpush.bf16.msra.mxu2 %v1294_v2  ;;  %v1301_v7 = vld [vmem:[#allocation5 + $0xf0] sm:$0xff]  ;;  %v1292_v10 = vld [vmem:[#allocation5 + $0xa8] sm:$0xff] }
  0x19   :  { %700 = vmatpush.bf16.msra.mxu3 %v1302_v3  ;;  %v1300_v11 = vld [vmem:[#allocation5 + $0xe8] sm:$0xff]  ;;  %v1275_v12 = vld [vmem:[#allocation5 + $0x20] sm:$0xff]  ;;  %v1274_v16 = vld [vmem:[#allocation5 + $0x18] sm:$0xff] }
  0x1a   :  { %662 = vmatpush.bf16.msra.mxu0 %v1277_v4  ;;  %v1283_v13 = vld [vmem:[#allocation5 + $0x60] sm:$0xff]  ;;  %v92_v18 = vld [vmem:[#allocation2 + $0x10] sm:$0xff]  ;;  %v1282_v19 = vld [vmem:[#allocation5 + $0x58] sm:$0xff] }
  0x1b   :  { %675 = vmatpush.bf16.msra.mxu1 %v1285_v5  ;;  %v1291_v14 = vld [vmem:[#allocation5 + $0xa0] sm:$0xff]  ;;  %v96_v21 = vld [vmem:[#allocation2 + $0x30] sm:$0xff]  ;;  %v1290_v22 = vld [vmem:[#allocation5 + $0x98] sm:$0xff]  ;;  %108 = vst [vmem:[#allocation1 + $0x1] ss:$4 sm:$0xff] %v92_v18 }
  0x1c   :  { %688 = vmatpush.bf16.msra.mxu2 %v1293_v6  ;;  %v1299_v15 = vld [vmem:[#allocation5 + $0xe0] sm:$0xff]  ;;  %v1298_v23 = vld [vmem:[#allocation5 + $0xd8] sm:$0xff]  ;;  %112 = vst [vmem:[#allocation1 + $0x3] ss:$4 sm:$0xff] %v96_v21  ;;  %v1273_v24 = vld [vmem:[#allocation5 + $0x10] sm:$0xff] }
  0x1d   :  { %701 = vmatpush.bf16.msra.mxu3 %v1301_v7  ;;  %v90_v17 = vld [vmem:[#allocation2] sm:$0xff]  ;;  %v1281_v25 = vld [vmem:[#allocation5 + $0x50] sm:$0xff]  ;;  %v91_v28 = vld [vmem:[#allocation2 + $0x8] sm:$0xff] }
  0x1e   :  { %663 = vmatpush.bf16.msra.mxu0 %v1276_v8  ;;  %v94_v20 = vld [vmem:[#allocation2 + $0x20] sm:$0xff]  ;;  %106 = vst [vmem:[#allocation1] ss:$4 sm:$0xff] %v90_v17  ;;  %v1289_v26 = vld [vmem:[#allocation5 + $0x90] sm:$0xff]  ;;  %v93_v29 = vld [vmem:[#allocation2 + $0x18] sm:$0xff] }
  0x1f   :  { %676 = vmatpush.bf16.msra.mxu1 %v1284_v9  ;;  %110 = vst [vmem:[#allocation1 + $0x2] ss:$4 sm:$0xff] %v94_v20  ;;  %v1297_v27 = vld [vmem:[#allocation5 + $0xd0] sm:$0xff]  ;;  %v1272_v30 = vld [vmem:[#allocation5 + $0x8] sm:$0xff]  ;;  %v1271_v35 = vld [vmem:[#allocation5] sm:$0xff] }
  0x20   :  { %689 = vmatpush.bf16.msra.mxu2 %v1292_v10  ;;  %v1280_v31 = vld [vmem:[#allocation5 + $0x48] sm:$0xff]  ;;  %114 = vst [vmem:[#allocation1 + $0x20] ss:$4 sm:$0xff] %v91_v28  ;;  %v97_v36 = vld [vmem:[#allocation2 + $0x38] sm:$0xff]  ;;  %v1279_v37 = vld [vmem:[#allocation5 + $0x40] sm:$0xff] }
  0x21   :  { %702 = vmatpush.bf16.msra.mxu3 %v1300_v11  ;;  %v1288_v32 = vld [vmem:[#allocation5 + $0x88] sm:$0xff]  ;;  %116 = vst [vmem:[#allocation1 + $0x21] ss:$4 sm:$0xff] %v93_v29  ;;  %v1287_v38 = vld [vmem:[#allocation5 + $0x80] sm:$0xff]  ;;  %v1310_v40 = vld [vmem:[#allocation5 + $0x138] sm:$0xff] }
  0x22   :  { %664 = vmatpush.bf16.msra.mxu0 %v1275_v12  ;;  %v1296_v33 = vld [vmem:[#allocation5 + $0xc8] sm:$0xff]  ;;  %v1295_v39 = vld [vmem:[#allocation5 + $0xc0] sm:$0xff]  ;;  %v1318_v42 = vld [vmem:[#allocation5 + $0x178] sm:$0xff]  ;;  %120 = vst [vmem:[#allocation1 + $0x23] ss:$4 sm:$0xff] %v97_v36 }
  0x23   :  { %677 = vmatpush.bf16.msra.mxu1 %v1283_v13  ;;  %v95_v34 = vld [vmem:[#allocation2 + $0x28] sm:$0xff]  ;;  %v1326_v46 = vld [vmem:[#allocation5 + $0x1b8] sm:$0xff]  ;;  %v1309_v52 = vld [vmem:[#allocation5 + $0x130] sm:$0xff] }
  0x24   :  { %690 = vmatpush.bf16.msra.mxu2 %v1291_v14  ;;  %118 = vst [vmem:[#allocation1 + $0x22] ss:$4 sm:$0xff] %v95_v34  ;;  %v1334_v47 = vld [vmem:[#allocation5 + $0x1f8] sm:$0xff]  ;;  %v1317_v53 = vld [vmem:[#allocation5 + $0x170] sm:$0xff]  ;;  %v1308_v56 = vld [vmem:[#allocation5 + $0x128] sm:$0xff] }
  0x25   :  { %703 = vmatpush.bf16.msra.mxu3 %v1299_v15  ;;  %v1325_v54 = vld [vmem:[#allocation5 + $0x1b0] sm:$0xff]  ;;  %v1316_v57 = vld [vmem:[#allocation5 + $0x168] sm:$0xff]  ;;  %v1307_v60 = vld [vmem:[#allocation5 + $0x120] sm:$0xff] }
  0x26   :  { %665 = vmatpush.bf16.msra.mxu0 %v1274_v16  ;;  %v123_v41 = vld.sshfl [vmem:[#allocation1 + $0x10] sm:$0xff pattern:$0x73625140]  ;;  %v121_v43 = vld.sshfl [vmem:[#allocation1] sm:$0xff pattern:$0x73625140] }
  0x27   :  { %678 = vmatpush.bf16.msra.mxu1 %v1282_v19  ;;  %v124_v44 = vld.sshfl [vmem:[#allocation1 + $0x18] sm:$0xff pattern:$0x73625140]  ;;  %v122_v45 = vld.sshfl [vmem:[#allocation1 + $0x8] sm:$0xff pattern:$0x73625140]  ;;  %v139_v48 = vpack.c.bf16 %v123_v41, %v123_v41  ;;  %v137_v49 = vpack.c.bf16 %v121_v43, %v121_v43 }
  0x28   :  { %691 = vmatpush.bf16.msra.mxu2 %v1290_v22  ;;  %v140_v50 = vpack.c.bf16 %v124_v44, %v124_v44  ;;  %v138_v51 = vpack.c.bf16 %v122_v45, %v122_v45  ;;  %v1333_v55 = vld [vmem:[#allocation5 + $0x1f0] sm:$0xff]  ;;  %v1324_v58 = vld [vmem:[#allocation5 + $0x1a8] sm:$0xff]  ;;  %v1315_v61 = vld [vmem:[#allocation5 + $0x160] sm:$0xff] }
  0x29   :  { %704 = vmatpush.bf16.msra.mxu3 %v1298_v23  ;;  %v1332_v59 = vld [vmem:[#allocation5 + $0x1e8] sm:$0xff]  ;;  %v1323_v62 = vld [vmem:[#allocation5 + $0x1a0] sm:$0xff]  ;;  %v1306_v0 = vld [vmem:[#allocation5 + $0x118] sm:$0xff] }
  0x2a   :  { %666 = vmatpush.bf16.msra.mxu0 %v1273_v24  ;;  %v1331_v63 = vld [vmem:[#allocation5 + $0x1e0] sm:$0xff]  ;;  %v1314_v1 = vld [vmem:[#allocation5 + $0x158] sm:$0xff]  ;;  %v1305_v4 = vld [vmem:[#allocation5 + $0x110] sm:$0xff] }
  0x2b   :  { %679 = vmatpush.bf16.msra.mxu1 %v1281_v25  ;;  %v1322_v2 = vld [vmem:[#allocation5 + $0x198] sm:$0xff]  ;;  %v1313_v5 = vld [vmem:[#allocation5 + $0x150] sm:$0xff]  ;;  %v1304_v8 = vld [vmem:[#allocation5 + $0x108] sm:$0xff] }
  0x2c   :  { %692 = vmatpush.bf16.msra.mxu2 %v1289_v26  ;;  %v1330_v3 = vld [vmem:[#allocation5 + $0x1d8] sm:$0xff]  ;;  %v1321_v6 = vld [vmem:[#allocation5 + $0x190] sm:$0xff]  ;;  %v1312_v9 = vld [vmem:[#allocation5 + $0x148] sm:$0xff] }
  0x2d   :  { %705 = vmatpush.bf16.msra.mxu3 %v1297_v27  ;;  %v1329_v7 = vld [vmem:[#allocation5 + $0x1d0] sm:$0xff]  ;;  %v1320_v10 = vld [vmem:[#allocation5 + $0x188] sm:$0xff]  ;;  %v1303_v12 = vld [vmem:[#allocation5 + $0x100] sm:$0xff] }
  0x2e   :  { %667 = vmatpush.bf16.msra.mxu0 %v1272_v30  ;;  %v1328_v11 = vld [vmem:[#allocation5 + $0x1c8] sm:$0xff]  ;;  %v1311_v13 = vld [vmem:[#allocation5 + $0x140] sm:$0xff]  ;;  %v125_v16 = vld.sshfl [vmem:[#allocation1 + $0x20] sm:$0xff pattern:$0x73625140] }
  0x2f   :  { %680 = vmatpush.bf16.msra.mxu1 %v1280_v31  ;;  %v1319_v14 = vld [vmem:[#allocation5 + $0x180] sm:$0xff]  ;;  %v127_v18 = vld.sshfl [vmem:[#allocation1 + $0x30] sm:$0xff pattern:$0x73625140]  ;;  %v141_v20 = vpack.c.bf16 %v125_v16, %v125_v16  ;;  %v1342_v24 = vld [vmem:[#allocation7 + $0x38] sm:$0xff] }
  0x30   :  { %693 = vmatpush.bf16.msra.mxu2 %v1288_v32  ;;  %v1327_v15 = vld [vmem:[#allocation5 + $0x1c0] sm:$0xff]  ;;  %v128_v19 = vld.sshfl [vmem:[#allocation1 + $0x38] sm:$0xff pattern:$0x73625140]  ;;  %v143_v22 = vpack.c.bf16 %v127_v18, %v127_v18  ;;  %v1340_v26 = vld [vmem:[#allocation7 + $0x28] sm:$0xff] }
  0x31   :  { %706 = vmatpush.bf16.msra.mxu3 %v1296_v33  ;;  %v126_v17 = vld.sshfl [vmem:[#allocation1 + $0x28] sm:$0xff pattern:$0x73625140]  ;;  %v144_v23 = vpack.c.bf16 %v128_v19, %v128_v19  ;;  %v1341_v25 = vld [vmem:[#allocation7 + $0x30] sm:$0xff]  ;;  %v1338_v28 = vld [vmem:[#allocation7 + $0x18] sm:$0xff] }
  0x32   :  { %668 = vmatpush.bf16.msra.mxu0 %v1271_v35  ;;  %v142_v21 = vpack.c.bf16 %v126_v17, %v126_v17  ;;  %v1339_v27 = vld [vmem:[#allocation7 + $0x20] sm:$0xff]  ;;  %v1337_v30 = vld [vmem:[#allocation7 + $0x10] sm:$0xff]  ;;  %v1336_v32 = vld [vmem:[#allocation7 + $0x8] sm:$0xff] }
  0x33   :  { %681 = vmatpush.bf16.msra.mxu1 %v1279_v37  ;;  %v1335_v36 = vld [vmem:[#allocation7] sm:$0xff]  ;;  %v1348_v44 = vld [vmem:[#allocation8 + $0x28] sm:$0xff] }
  0x34   :  { %694 = vmatpush.bf16.msra.mxu2 %v1287_v38  ;;  %v1360_v38 = vld [vmem:[%s1566_s2] ss:$0 sm:$0xff] }
  0x35   :  { %707 = vmatpush.bf16.msra.mxu3 %v1295_v39  ;;  %669 = vmatmul.bf16.vlgmr.msra.gmra.mxu0 %v137_v49  ;;  %v1350_v39 = vld [vmem:[#allocation8 + $0x38] sm:$0xff] }
  0x36   :  { %713 = vmatpush.bf16.msrb.mxu0 %v1310_v40  ;;  %682 = vmatmul.bf16.vlgmr.msra.gmra.mxu1 %v138_v51 }
  0x37   :  { %726 = vmatpush.bf16.msrb.mxu1 %v1318_v42  ;;  %695 = vmatmul.bf16.vlgmr.msra.gmra.mxu2 %v139_v48  ;;  %v1349_v42 = vld [vmem:[#allocation8 + $0x30] sm:$0xff]  ;;  %v1346_v48 = vld [vmem:[#allocation8 + $0x18] sm:$0xff] }
  0x38   :  { %739 = vmatpush.bf16.msrb.mxu2 %v1326_v46  ;;  %708 = vmatmul.bf16.vlgmr.msra.gmra.mxu3 %v140_v50  ;;  %v1347_v46 = vld [vmem:[#allocation8 + $0x20] sm:$0xff] }
  0x39   :  { %752 = vmatpush.bf16.msrb.mxu3 %v1334_v47 }
  0x3a   :  { %714 = vmatpush.bf16.msrb.mxu0 %v1309_v52 }
  0x3b   :  { %727 = vmatpush.bf16.msrb.mxu1 %v1317_v53  ;;  %v1345_v53 = vld [vmem:[#allocation8 + $0x10] sm:$0xff] }
  0x3c   :  { %740 = vmatpush.bf16.msrb.mxu2 %v1325_v54 }
  0x3d   :  { %753 = vmatpush.bf16.msrb.mxu3 %v1333_v55 }
  0x3e   :  { %715 = vmatpush.bf16.msrb.mxu0 %v1308_v56 }
  0x3f   :  { %728 = vmatpush.bf16.msrb.mxu1 %v1316_v57 }
  0x40   :  { %741 = vmatpush.bf16.msrb.mxu2 %v1324_v58 }
  0x41   :  { %754 = vmatpush.bf16.msrb.mxu3 %v1332_v59 }
  0x42   :  { %716 = vmatpush.bf16.msrb.mxu0 %v1307_v60 }
  0x43   :  { %729 = vmatpush.bf16.msrb.mxu1 %v1315_v61 }
  0x44   :  { %742 = vmatpush.bf16.msrb.mxu2 %v1323_v62 }
  0x45   :  { %755 = vmatpush.bf16.msrb.mxu3 %v1331_v63 }
  0x46   :  { %717 = vmatpush.bf16.msrb.mxu0 %v1306_v0 }
  0x47   :  { %730 = vmatpush.bf16.msrb.mxu1 %v1314_v1  ;;  %v1344_v1 = vld [vmem:[#allocation8 + $0x8] sm:$0xff] }
  0x48   :  { %743 = vmatpush.bf16.msrb.mxu2 %v1322_v2  ;;  %v1343_v2 = vld [vmem:[#allocation8] sm:$0xff] }
  0x49   :  { %756 = vmatpush.bf16.msrb.mxu3 %v1330_v3  ;;  %v1361_v3 = vld [vmem:[%s1568_s4] ss:$0 sm:$0xff] }
  0x4a   :  { %718 = vmatpush.bf16.msrb.mxu0 %v1305_v4 }
  0x4b   :  { %731 = vmatpush.bf16.msrb.mxu1 %v1313_v5 }
  0x4c   :  { %744 = vmatpush.bf16.msrb.mxu2 %v1321_v6 }
  0x4d   :  { %757 = vmatpush.bf16.msrb.mxu3 %v1329_v7 }
  0x4e   :  { %719 = vmatpush.bf16.msrb.mxu0 %v1304_v8 }
  0x4f   :  { %732 = vmatpush.bf16.msrb.mxu1 %v1312_v9  ;;  %v1362_v9 = vld [vmem:[%s1570_s6] ss:$0 sm:$0xff] }
  0x50   :  { %745 = vmatpush.bf16.msrb.mxu2 %v1320_v10 }
  0x51   :  { %758 = vmatpush.bf16.msrb.mxu3 %v1328_v11 }
  0x52   :  { %720 = vmatpush.bf16.msrb.mxu0 %v1303_v12 }
  0x53   :  { %733 = vmatpush.bf16.msrb.mxu1 %v1311_v13 }
  0x54   :  { %746 = vmatpush.bf16.msrb.mxu2 %v1319_v14 }
  0x55   :  { %759 = vmatpush.bf16.msrb.mxu3 %v1327_v15  ;;  %721 = vmatmul.bf16.vlgmr.msrb.gmra.mxu0 %v141_v20 }
  0x56   :  { %734 = vmatmul.bf16.vlgmr.msrb.gmra.mxu1 %v142_v21  ;;  %835 = vmatpush.bf16.msra.mxu0 %v1342_v24 }
  0x57   :  { %747 = vmatmul.bf16.vlgmr.msrb.gmra.mxu2 %v143_v22  ;;  %918 = vmatpush.bf16.msra.mxu1 %v1350_v39 }
  0x58   :  { %760 = vmatmul.bf16.vlgmr.msrb.gmra.mxu3 %v144_v23 }
  0x5a   :  { %836 = vmatpush.bf16.msra.mxu0 %v1341_v25 }
  0x5b   :  { %919 = vmatpush.bf16.msra.mxu1 %v1349_v42 }
  0x5e   :  { %837 = vmatpush.bf16.msra.mxu0 %v1340_v26 }
  0x5f   :  { %920 = vmatpush.bf16.msra.mxu1 %v1348_v44 }
  0x62   :  { %838 = vmatpush.bf16.msra.mxu0 %v1339_v27 }
  0x63   :  { %921 = vmatpush.bf16.msra.mxu1 %v1347_v46 }
  0x66   :  { %839 = vmatpush.bf16.msra.mxu0 %v1338_v28 }
  0x67   :  { %922 = vmatpush.bf16.msra.mxu1 %v1346_v48 }
  0x6a   :  { %840 = vmatpush.bf16.msra.mxu0 %v1337_v30 }
  0x6b   :  { %923 = vmatpush.bf16.msra.mxu1 %v1345_v53 }
  0x6e   :  { %841 = vmatpush.bf16.msra.mxu0 %v1336_v32 }
  0x6f   :  { %924 = vmatpush.bf16.msra.mxu1 %v1344_v1 }
  0x72   :  { %842 = vmatpush.bf16.msra.mxu0 %v1335_v36 }
  0x73   :  { %925 = vmatpush.bf16.msra.mxu1 %v1343_v2 }
  0xb2   :  { %v670_v29 = vpop.f32.mrf.mxu0 }
  0xb3   :  { %v683_v31 = vpop.f32.mrf.mxu1  ;;  %v671_v43 = vadd.f32 %v1360_v38, %v670_v29 }
  0xb5   :  { %v684_v45 = vadd.f32 %v683_v31, %v671_v43 }
  0xba   :  { %v696_v33 = vpop.f32.mrf.mxu2  ;;  %v672_v35 = vpop.f32.mrf.mxu0 }
  0xbb   :  { %v709_v34 = vpop.f32.mrf.mxu3  ;;  %v685_v37 = vpop.f32.mrf.mxu1  ;;  %v697_v47 = vadd.f32 %v696_v33, %v684_v45 }
  0xbd   :  { %v710_v49 = vadd.f32 %v709_v34, %v697_v47 }
  0xc2   :  { %v698_v40 = vpop.f32.mrf.mxu2 }
  0xc3   :  { %v711_v41 = vpop.f32.mrf.mxu3 }
  0xd2   :  { %v722_v50 = vpop.f32.mrf.mxu0 }
  0xd3   :  { %v735_v51 = vpop.f32.mrf.mxu1  ;;  %v723_v52 = vadd.f32 %v722_v50, %v710_v49 }
  0xd5   :  { %v736_v54 = vadd.f32 %v735_v51, %v723_v52 }
  0xda   :  { %v748_v55 = vpop.f32.mrf.mxu2  ;;  %v724_v58 = vpop.f32.mrf.mxu0 }
  0xdb   :  { %v761_v56 = vpop.f32.mrf.mxu3  ;;  %v749_v57 = vadd.f32 %v748_v55, %v736_v54  ;;  %v737_v59 = vpop.f32.mrf.mxu1 }
  0xdd   :  { %v762_v60 = vadd.f32 %v761_v56, %v749_v57 }
  0xdf   :  { %v765_v61 = vmax.f32 %v762_v60, 0.0 }
  0xe1   :  { %v766_v62 = vpack.c.bf16 %v765_v61, %v765_v61 }
  0xe2   :  { %v750_v63 = vpop.f32.mrf.mxu2 }
  0xe3   :  { %v763_v0 = vpop.f32.mrf.mxu3  ;;  %843 = vmatmul.bf16.vlgmr.msra.gmra.mxu0 %v766_v62 }
 0x160   :  { %v844_v4 = vpop.f32.mrf.mxu0 }
 0x161   :  { %v845_v5 = vadd.f32 %v1361_v3, %v844_v4 }
 0x163   :  { %v848_v6 = vmax.f32 %v845_v5, 0.0 }
 0x165   :  { %v849_v7 = vpack.c.bf16 %v848_v6, %v848_v6 }
 0x167   :  { %926 = vmatmul.bf16.vlgmr.msra.gmra.mxu1 %v849_v7 }
 0x168   :  { %v846_v8 = vpop.f32.mrf.mxu0 }
 0x1e4   :  { %v927_v10 = vpop.f32.mrf.mxu1 }
 0x1e5   :  { %v928_v11 = vadd.f32 %v1362_v9, %v927_v10 }
 0x1e7   :  { %931 = vst [vmem:[#allocation10] sm:$0xff] %v928_v11 }
 0x1e8   :  { %942 = dma.vmem_to_hbm [thread:$0]  %s938_s27, 128, %s940_s30, [#allocation4]  }
 0x1ec   :  { %v929_v12 = vpop.f32.mrf.mxu1 }
 0x1ed   :  { %1489 = dma.done.wait [#allocation4], 128  }
 0x1ee   :  { %1490 = vsyncadd [#allocation4], 4294967168 }
 0x1ef   :  { %947 = vsyncpa [#allocation3], 1 }
 0x1f0   :  { %948 = vsyncpa [#allocation6], 1 }
 0x1f1   :  { %949 = vsyncpa [#allocation9], 1 }
 0x1f2   :  { %950 = vsyncpa [#allocation4], 1 }

</bundles_post_ra>
